<compile_context>
chip_gen: v7x
topology: tpu7x:2x2x1
jax: 0.10.0
libtpu: 0.0.40
codegen_flags: <defaults>
</compile_context>

<pallas_src>
import functools
import math

import jax
import jax.numpy as jnp
from jax.experimental import pallas as pl
from jax.experimental.pallas import tpu as pltpu


def _attention_kernel(x_ref, wqkv_ref, bqkv_ref, wproj_ref, bproj_ref, out_ref,
                      *, n_head, seq_len):
    """One grid step: attention forward for a (BB*T, C) block of rows.

    x_ref:     (BB*T, C)   compute_dtype (rows of BB whole batch elements)
    wqkv_ref:  (C, 3C)     compute_dtype, Q columns pre-scaled by 1/sqrt(dk)
    bqkv_ref:  (1, 3C)     f32, Q part pre-scaled by 1/sqrt(dk)
    wproj_ref: (C, C)      compute_dtype
    bproj_ref: (1, C)      f32
    out_ref:   (BB*T, C)
    """
    rows, C = x_ref.shape
    T = seq_len
    BB = rows // T
    H = n_head
    dk = C // H
    cdt = x_ref.dtype

    # Single lane-dense QKV projection on the MXU (replaces 3*H tiny per-head
    # matmuls); f32 accumulation, f32 bias (Q scale already folded in).
    qkv = jnp.dot(x_ref[...], wqkv_ref[...], preferred_element_type=jnp.float32)
    qkv = qkv + bqkv_ref[...]                                   # (rows, 3C) f32

    # Per-head lane split (cheap XLU work that overlaps the MXU slot).  The
    # score / weighted-sum matmuls are inherently per-(batch, head), so the
    # static H loop adds no MXU work vs. a batched einsum over B*H.
    y_heads = []
    for h in range(H):
        q = qkv[:, h * dk:(h + 1) * dk].reshape(BB, T, dk).astype(cdt)
        k = qkv[:, C + h * dk:C + (h + 1) * dk].reshape(BB, T, dk).astype(cdt)
        v = qkv[:, 2 * C + h * dk:2 * C + (h + 1) * dk].reshape(BB, T, dk).astype(cdt)

        att = jnp.einsum('bqd,bkd->bqk', q, k,
                         preferred_element_type=jnp.float32)    # (BB, T, T) f32

        # Softmax stays f32 (VPU/EUP path — required on v5e).
        att = att - jnp.max(att, axis=-1, keepdims=True)
        p = jnp.exp(att)
        p = p * pl.reciprocal(jnp.sum(p, axis=-1, keepdims=True), approx=True)
        # TODO(synk): attn_dropout omitted (identity in eval / p=0).

        yh = jnp.einsum('bqk,bkd->bqd', p.astype(cdt), v,
                        preferred_element_type=jnp.float32)     # (BB, T, dk) f32
        y_heads.append(yh.reshape(rows, dk))

    # Fused head merge: one lane concatenation back to (rows, C) (no per-head
    # f32 (rows, C) intermediates, no VPU sum), then a single lane-major
    # output-projection matmul.
    y2 = jnp.concatenate(y_heads, axis=-1).astype(cdt)          # (rows, C)
    out = jnp.dot(y2, wproj_ref[...], preferred_element_type=jnp.float32)
    out = out + bproj_ref[...]
    # TODO(synk): resid_dropout omitted (identity in eval / p=0).

    out_ref[...] = out.astype(out_ref.dtype)


def _pick_batch_block(batch, seq_len, max_rows=1024):
    """Per-step batch block: (a) keep >= 2 grid steps when possible so both
    TensorCores are used on v7x, (b) keep the row block a multiple of the
    8-sublane tile, (c) cap the per-step row count for VMEM."""
    for bb in range(batch // 2, 0, -1):
        if batch % bb == 0 and (bb * seq_len) % 8 == 0 and bb * seq_len <= max_rows:
            return bb
    return batch   # fall back to a single full-array block (always legal)


def audio_self_attention(x, w_attn, b_attn, w_proj, b_proj, n_head,
                         compute_dtype=jnp.float32):
    """x: (B, T, C); w_attn: (C, 3C); b_attn: (.., 3C); w_proj: (C, C); b_proj: (.., C).

    Weights are stored (in, out) so the kernel computes x @ W + b (equivalent
    to PyTorch's x @ W.T + b with W stored (out, in)).

    compute_dtype sets the MXU operand dtype.  bf16 operands are valid on all
    of v5e / v6e / v7x (the MXU takes bf16 natively everywhere; softmax, bias
    adds and accumulation stay f32).
    """
    B, T, C = x.shape
    assert C % n_head == 0
    dk = C // n_head
    scale = 1.0 / math.sqrt(dk)
    orig_dtype = x.dtype

    # ---- one-time parameter prep (wrapper side, not per grid step) ----
    # * 1/sqrt(dk) folded into the Q columns of W_qkv / b_qkv.
    # * W_qkv kept lane-major as (C, 3C) so the kernel runs ONE QKV matmul.
    # * Weights and x staged in compute_dtype (halves DMA bytes on the bf16
    #   path, no per-step casts in the kernel); biases stay f32.
    w_qkv = jnp.asarray(w_attn, jnp.float32).at[:, :C].multiply(scale).astype(compute_dtype)
    b_qkv = jnp.asarray(b_attn, jnp.float32).reshape(1, 3 * C).at[:, :C].multiply(scale)
    w_pj = jnp.asarray(w_proj, compute_dtype)
    b_pj = jnp.asarray(b_proj, jnp.float32).reshape(1, C)
    x_rows = x.reshape(B * T, C).astype(compute_dtype)          # (rows, C)

    BB = _pick_batch_block(B, T)
    RB = BB * T                      # rows per grid step
    grid = (B // BB,)

    kernel = functools.partial(_attention_kernel, n_head=n_head, seq_len=T)

    out_rows = pl.pallas_call(
        kernel,
        out_shape=jax.ShapeDtypeStruct((B * T, C), orig_dtype),
        grid_spec=pltpu.PrefetchScalarGridSpec(
            num_scalar_prefetch=0,
            grid=grid,
            in_specs=[
                pl.BlockSpec((RB, C), lambda i: (i, 0)),        # x rows
                # Constant-index weight specs stay resident across grid steps.
                # TODO(synk): at production sizes mark these
                # pipeline_mode=pl.Buffered(1) so they are not double-buffered
                # (matters on v7x's 64 MiB VMEM; negligible at this footprint).
                pl.BlockSpec((C, 3 * C), lambda i: (0, 0)),     # W_qkv (scale folded)
                pl.BlockSpec((1, 3 * C), lambda i: (0, 0)),     # b_qkv (f32)
                pl.BlockSpec((C, C), lambda i: (0, 0)),         # W_proj
                pl.BlockSpec((1, C), lambda i: (0, 0)),         # b_proj (f32)
            ],
            out_specs=pl.BlockSpec((RB, C), lambda i: (i, 0)),
        ),
        compiler_params=pltpu.CompilerParams(
            dimension_semantics=("parallel",),
            # Explicit VMEM budget: safe on every generation (<= 64 MiB v7x
            # per-core VMEM) and far above this kernel's ~100 KB footprint.
            vmem_limit_bytes=32 * 1024 * 1024,
        ),
    )(x_rows, w_qkv, b_qkv, w_pj, b_pj)

    return out_rows.reshape(B, T, C)


def reference(x, w_attn, b_attn, w_proj, b_proj, n_head):
    """Plain-JAX reference mirroring the PyTorch forward (eval mode)."""
    B, T, C = x.shape
    dk = C // n_head
    qkv = x @ w_attn + b_attn.reshape(1, 3 * C)
    q, k, v = jnp.split(qkv, 3, axis=-1)
    q = q.reshape(B, T, n_head, dk).transpose(0, 2, 1, 3)
    k = k.reshape(B, T, n_head, dk).transpose(0, 2, 1, 3)
    v = v.reshape(B, T, n_head, dk).transpose(0, 2, 1, 3)
    att = (q @ jnp.swapaxes(k, -2, -1)) * (1.0 / math.sqrt(dk))
    att = jax.nn.softmax(att, axis=-1)
    y = att @ v
    y = y.transpose(0, 2, 1, 3).reshape(B, T, C)
    return y @ w_proj + b_proj.reshape(1, C)


if __name__ == "__main__":
    # Small shapes consistent with the module: B=2, T=8, n_embd=32, n_head=4.
    B, T, C, n_head = 2, 8, 32, 4

    key = jax.random.PRNGKey(0)
    kx, kw1, kb1, kw2, kb2 = jax.random.split(key, 5)

    x = jax.random.normal(kx, (B, T, C), dtype=jnp.float32)
    w_attn = jax.random.normal(kw1, (C, 3 * C), dtype=jnp.float32) * (1.0 / math.sqrt(C))
    b_attn = jax.random.normal(kb1, (1, 3 * C), dtype=jnp.float32) * 0.02
    w_proj = jax.random.normal(kw2, (C, C), dtype=jnp.float32) * (1.0 / math.sqrt(C))
    b_proj = jax.random.normal(kb2, (1, C), dtype=jnp.float32) * 0.02

    ref = reference(x, w_attn, b_attn, w_proj, b_proj, n_head)

    # f32 MXU operands (exact up to the approximate softmax reciprocal).
    out_f32 = jax.block_until_ready(
        audio_self_attention(x, w_attn, b_attn, w_proj, b_proj, n_head,
                             compute_dtype=jnp.float32))
    assert out_f32.shape == (B, T, C)
    err_f32 = float(jnp.max(jnp.abs(out_f32 - ref)))
    assert jnp.allclose(out_f32, ref, atol=5e-3, rtol=5e-3), (
        "f32 kernel mismatch vs reference, max abs err = %g" % err_f32)

    # bf16 MXU operands (fast path on every generation), f32 accum + softmax.
    out_bf16 = jax.block_until_ready(
        audio_self_attention(x, w_attn, b_attn, w_proj, b_proj, n_head,
                             compute_dtype=jnp.bfloat16))
    err_bf16 = float(jnp.max(jnp.abs(out_bf16 - ref)))
    assert jnp.allclose(out_bf16, ref, atol=3e-2, rtol=3e-2), (
        "bf16 kernel mismatch vs reference, max abs err = %g" % err_bf16)

    print("KERNEL_OK")
</pallas_src>

<mosaic_0001>
module attributes {stable_mosaic.version = 11 : i64} {
  func.func @_attention_kernel(%arg0: i32, %arg1: memref<8x32xf32, #tpu.memory_space<vmem>>, %arg2: memref<32x96xf32, #tpu.memory_space<vmem>>, %arg3: memref<1x96xf32, #tpu.memory_space<vmem>>, %arg4: memref<32x32xf32, #tpu.memory_space<vmem>>, %arg5: memref<1x32xf32, #tpu.memory_space<vmem>>, %arg6: memref<8x32xf32, #tpu.memory_space<vmem>>) attributes {dimension_semantics = [#tpu.dimension_semantics<parallel>], iteration_bounds = array<i64: 2>, scalar_prefetch = 0 : i64, scratch_operands = 0 : i64, tpu.core_type = #tpu.core_type<tc>, window_params = [{transform_indices = @transform_0, window_bounds = array<i64: 8, 32>}, {pipeline_mode = #tpu.pipeline_mode<synchronous>, transform_indices = @transform_1, window_bounds = array<i64: 32, 96>}, {pipeline_mode = #tpu.pipeline_mode<synchronous>, transform_indices = @transform_2, window_bounds = array<i64: 1, 96>}, {pipeline_mode = #tpu.pipeline_mode<synchronous>, transform_indices = @transform_3, window_bounds = array<i64: 32, 32>}, {pipeline_mode = #tpu.pipeline_mode<synchronous>, transform_indices = @transform_4, window_bounds = array<i64: 1, 32>}, {transform_indices = @transform_5, window_bounds = array<i64: 8, 32>}]} {
    %c0 = arith.constant 0 : index
    %c0_0 = arith.constant 0 : index
    %0 = vector.load %arg1[%c0, %c0_0] : memref<8x32xf32, #tpu.memory_space<vmem>>, vector<8x32xf32>
    %c0_1 = arith.constant 0 : index
    %c0_2 = arith.constant 0 : index
    %1 = vector.load %arg2[%c0_1, %c0_2] : memref<32x96xf32, #tpu.memory_space<vmem>>, vector<32x96xf32>
    %cst = arith.constant dense<0.000000e+00> : vector<8x96xf32>
    %2 = tpu.matmul %0, %1, %cst {dimension_numbers = #tpu.dot_dimension_numbers<[1], [0], [0], [1], [0, 0, 1, 1], [], []>} : vector<8x32xf32>, vector<32x96xf32>, vector<8x96xf32> -> vector<8x96xf32>
    %c0_3 = arith.constant 0 : index
    %c0_4 = arith.constant 0 : index
    %3 = vector.load %arg3[%c0_3, %c0_4] : memref<1x96xf32, #tpu.memory_space<vmem>>, vector<1x96xf32>
    %4 = vector.broadcast %3 : vector<1x96xf32> to vector<8x96xf32>
    %5 = arith.addf %2, %4 : vector<8x96xf32>
    %6 = vector.extract_strided_slice %5 {offsets = [0, 0], sizes = [8, 8], strides = [1, 1]} : vector<8x96xf32> to vector<8x8xf32>
    %7 = vector.shape_cast %6 : vector<8x8xf32> to vector<1x8x8xf32>
    %8 = vector.extract_strided_slice %5 {offsets = [0, 32], sizes = [8, 8], strides = [1, 1]} : vector<8x96xf32> to vector<8x8xf32>
    %9 = vector.shape_cast %8 : vector<8x8xf32> to vector<1x8x8xf32>
    %10 = vector.extract_strided_slice %5 {offsets = [0, 64], sizes = [8, 8], strides = [1, 1]} : vector<8x96xf32> to vector<8x8xf32>
    %11 = vector.shape_cast %10 : vector<8x8xf32> to vector<1x8x8xf32>
    "tpu.trace_start"() <{level = 10 : i32, message = "bqd,bkd->bqk"}> : () -> ()
    %cst_5 = arith.constant dense<0.000000e+00> : vector<1x8x8xf32>
    %12 = tpu.matmul %7, %9, %cst_5 {dimension_numbers = #tpu.dot_dimension_numbers<[2], [2], [1], [1], [0, 0, 0, 1, 1, 1], [0], [0]>} : vector<1x8x8xf32>, vector<1x8x8xf32>, vector<1x8x8xf32> -> vector<1x8x8xf32>
    "tpu.trace_stop"() : () -> ()
    %cst_6 = arith.constant dense<0xFF800000> : vector<1x8xf32>
    %13 = vector.multi_reduction <maximumf>, %12, %cst_6 [2] : vector<1x8x8xf32> to vector<1x8xf32>
    %14 = vector.shape_cast %13 : vector<1x8xf32> to vector<1x8x1xf32>
    %15 = vector.broadcast %14 : vector<1x8x1xf32> to vector<1x8x8xf32>
    %16 = arith.subf %12, %15 : vector<1x8x8xf32>
    %17 = math.exp %16 : vector<1x8x8xf32>
    %cst_7 = arith.constant dense<0.000000e+00> : vector<1x8xf32>
    %18 = vector.multi_reduction <add>, %17, %cst_7 [2] : vector<1x8x8xf32> to vector<1x8xf32>
    %19 = vector.shape_cast %18 : vector<1x8xf32> to vector<1x8x1xf32>
    %20 = tpu.reciprocal %19 {approx = true} : vector<1x8x1xf32> -> vector<1x8x1xf32>
    %21 = vector.broadcast %20 : vector<1x8x1xf32> to vector<1x8x8xf32>
    %22 = arith.mulf %17, %21 : vector<1x8x8xf32>
    "tpu.trace_start"() <{level = 10 : i32, message = "bqk,bkd->bqd"}> : () -> ()
    %cst_8 = arith.constant dense<0.000000e+00> : vector<1x8x8xf32>
    %23 = tpu.matmul %22, %11, %cst_8 {dimension_numbers = #tpu.dot_dimension_numbers<[2], [1], [1], [2], [0, 0, 0, 1, 1, 2], [0], [0]>} : vector<1x8x8xf32>, vector<1x8x8xf32>, vector<1x8x8xf32> -> vector<1x8x8xf32>
    "tpu.trace_stop"() : () -> ()
    %24 = vector.shape_cast %23 : vector<1x8x8xf32> to vector<8x8xf32>
    %25 = vector.extract_strided_slice %5 {offsets = [0, 8], sizes = [8, 8], strides = [1, 1]} : vector<8x96xf32> to vector<8x8xf32>
    %26 = vector.shape_cast %25 : vector<8x8xf32> to vector<1x8x8xf32>
    %27 = vector.extract_strided_slice %5 {offsets = [0, 40], sizes = [8, 8], strides = [1, 1]} : vector<8x96xf32> to vector<8x8xf32>
    %28 = vector.shape_cast %27 : vector<8x8xf32> to vector<1x8x8xf32>
    %29 = vector.extract_strided_slice %5 {offsets = [0, 72], sizes = [8, 8], strides = [1, 1]} : vector<8x96xf32> to vector<8x8xf32>
    %30 = vector.shape_cast %29 : vector<8x8xf32> to vector<1x8x8xf32>
    "tpu.trace_start"() <{level = 10 : i32, message = "bqd,bkd->bqk"}> : () -> ()
    %cst_9 = arith.constant dense<0.000000e+00> : vector<1x8x8xf32>
    %31 = tpu.matmul %26, %28, %cst_9 {dimension_numbers = #tpu.dot_dimension_numbers<[2], [2], [1], [1], [0, 0, 0, 1, 1, 1], [0], [0]>} : vector<1x8x8xf32>, vector<1x8x8xf32>, vector<1x8x8xf32> -> vector<1x8x8xf32>
    "tpu.trace_stop"() : () -> ()
    %cst_10 = arith.constant dense<0xFF800000> : vector<1x8xf32>
    %32 = vector.multi_reduction <maximumf>, %31, %cst_10 [2] : vector<1x8x8xf32> to vector<1x8xf32>
    %33 = vector.shape_cast %32 : vector<1x8xf32> to vector<1x8x1xf32>
    %34 = vector.broadcast %33 : vector<1x8x1xf32> to vector<1x8x8xf32>
    %35 = arith.subf %31, %34 : vector<1x8x8xf32>
    %36 = math.exp %35 : vector<1x8x8xf32>
    %cst_11 = arith.constant dense<0.000000e+00> : vector<1x8xf32>
    %37 = vector.multi_reduction <add>, %36, %cst_11 [2] : vector<1x8x8xf32> to vector<1x8xf32>
    %38 = vector.shape_cast %37 : vector<1x8xf32> to vector<1x8x1xf32>
    %39 = tpu.reciprocal %38 {approx = true} : vector<1x8x1xf32> -> vector<1x8x1xf32>
    %40 = vector.broadcast %39 : vector<1x8x1xf32> to vector<1x8x8xf32>
    %41 = arith.mulf %36, %40 : vector<1x8x8xf32>
    "tpu.trace_start"() <{level = 10 : i32, message = "bqk,bkd->bqd"}> : () -> ()
    %cst_12 = arith.constant dense<0.000000e+00> : vector<1x8x8xf32>
    %42 = tpu.matmul %41, %30, %cst_12 {dimension_numbers = #tpu.dot_dimension_numbers<[2], [1], [1], [2], [0, 0, 0, 1, 1, 2], [0], [0]>} : vector<1x8x8xf32>, vector<1x8x8xf32>, vector<1x8x8xf32> -> vector<1x8x8xf32>
    "tpu.trace_stop"() : () -> ()
    %43 = vector.shape_cast %42 : vector<1x8x8xf32> to vector<8x8xf32>
    %44 = vector.extract_strided_slice %5 {offsets = [0, 16], sizes = [8, 8], strides = [1, 1]} : vector<8x96xf32> to vector<8x8xf32>
    %45 = vector.shape_cast %44 : vector<8x8xf32> to vector<1x8x8xf32>
    %46 = vector.extract_strided_slice %5 {offsets = [0, 48], sizes = [8, 8], strides = [1, 1]} : vector<8x96xf32> to vector<8x8xf32>
    %47 = vector.shape_cast %46 : vector<8x8xf32> to vector<1x8x8xf32>
    %48 = vector.extract_strided_slice %5 {offsets = [0, 80], sizes = [8, 8], strides = [1, 1]} : vector<8x96xf32> to vector<8x8xf32>
    %49 = vector.shape_cast %48 : vector<8x8xf32> to vector<1x8x8xf32>
    "tpu.trace_start"() <{level = 10 : i32, message = "bqd,bkd->bqk"}> : () -> ()
    %cst_13 = arith.constant dense<0.000000e+00> : vector<1x8x8xf32>
    %50 = tpu.matmul %45, %47, %cst_13 {dimension_numbers = #tpu.dot_dimension_numbers<[2], [2], [1], [1], [0, 0, 0, 1, 1, 1], [0], [0]>} : vector<1x8x8xf32>, vector<1x8x8xf32>, vector<1x8x8xf32> -> vector<1x8x8xf32>
    "tpu.trace_stop"() : () -> ()
    %cst_14 = arith.constant dense<0xFF800000> : vector<1x8xf32>
    %51 = vector.multi_reduction <maximumf>, %50, %cst_14 [2] : vector<1x8x8xf32> to vector<1x8xf32>
    %52 = vector.shape_cast %51 : vector<1x8xf32> to vector<1x8x1xf32>
    %53 = vector.broadcast %52 : vector<1x8x1xf32> to vector<1x8x8xf32>
    %54 = arith.subf %50, %53 : vector<1x8x8xf32>
    %55 = math.exp %54 : vector<1x8x8xf32>
    %cst_15 = arith.constant dense<0.000000e+00> : vector<1x8xf32>
    %56 = vector.multi_reduction <add>, %55, %cst_15 [2] : vector<1x8x8xf32> to vector<1x8xf32>
    %57 = vector.shape_cast %56 : vector<1x8xf32> to vector<1x8x1xf32>
    %58 = tpu.reciprocal %57 {approx = true} : vector<1x8x1xf32> -> vector<1x8x1xf32>
    %59 = vector.broadcast %58 : vector<1x8x1xf32> to vector<1x8x8xf32>
    %60 = arith.mulf %55, %59 : vector<1x8x8xf32>
    "tpu.trace_start"() <{level = 10 : i32, message = "bqk,bkd->bqd"}> : () -> ()
    %cst_16 = arith.constant dense<0.000000e+00> : vector<1x8x8xf32>
    %61 = tpu.matmul %60, %49, %cst_16 {dimension_numbers = #tpu.dot_dimension_numbers<[2], [1], [1], [2], [0, 0, 0, 1, 1, 2], [0], [0]>} : vector<1x8x8xf32>, vector<1x8x8xf32>, vector<1x8x8xf32> -> vector<1x8x8xf32>
    "tpu.trace_stop"() : () -> ()
    %62 = vector.shape_cast %61 : vector<1x8x8xf32> to vector<8x8xf32>
    %63 = vector.extract_strided_slice %5 {offsets = [0, 24], sizes = [8, 8], strides = [1, 1]} : vector<8x96xf32> to vector<8x8xf32>
    %64 = vector.shape_cast %63 : vector<8x8xf32> to vector<1x8x8xf32>
    %65 = vector.extract_strided_slice %5 {offsets = [0, 56], sizes = [8, 8], strides = [1, 1]} : vector<8x96xf32> to vector<8x8xf32>
    %66 = vector.shape_cast %65 : vector<8x8xf32> to vector<1x8x8xf32>
    %67 = vector.extract_strided_slice %5 {offsets = [0, 88], sizes = [8, 8], strides = [1, 1]} : vector<8x96xf32> to vector<8x8xf32>
    %68 = vector.shape_cast %67 : vector<8x8xf32> to vector<1x8x8xf32>
    "tpu.trace_start"() <{level = 10 : i32, message = "bqd,bkd->bqk"}> : () -> ()
    %cst_17 = arith.constant dense<0.000000e+00> : vector<1x8x8xf32>
    %69 = tpu.matmul %64, %66, %cst_17 {dimension_numbers = #tpu.dot_dimension_numbers<[2], [2], [1], [1], [0, 0, 0, 1, 1, 1], [0], [0]>} : vector<1x8x8xf32>, vector<1x8x8xf32>, vector<1x8x8xf32> -> vector<1x8x8xf32>
    "tpu.trace_stop"() : () -> ()
    %cst_18 = arith.constant dense<0xFF800000> : vector<1x8xf32>
    %70 = vector.multi_reduction <maximumf>, %69, %cst_18 [2] : vector<1x8x8xf32> to vector<1x8xf32>
    %71 = vector.shape_cast %70 : vector<1x8xf32> to vector<1x8x1xf32>
    %72 = vector.broadcast %71 : vector<1x8x1xf32> to vector<1x8x8xf32>
    %73 = arith.subf %69, %72 : vector<1x8x8xf32>
    %74 = math.exp %73 : vector<1x8x8xf32>
    %cst_19 = arith.constant dense<0.000000e+00> : vector<1x8xf32>
    %75 = vector.multi_reduction <add>, %74, %cst_19 [2] : vector<1x8x8xf32> to vector<1x8xf32>
    %76 = vector.shape_cast %75 : vector<1x8xf32> to vector<1x8x1xf32>
    %77 = tpu.reciprocal %76 {approx = true} : vector<1x8x1xf32> -> vector<1x8x1xf32>
    %78 = vector.broadcast %77 : vector<1x8x1xf32> to vector<1x8x8xf32>
    %79 = arith.mulf %74, %78 : vector<1x8x8xf32>
    "tpu.trace_start"() <{level = 10 : i32, message = "bqk,bkd->bqd"}> : () -> ()
    %cst_20 = arith.constant dense<0.000000e+00> : vector<1x8x8xf32>
    %80 = tpu.matmul %79, %68, %cst_20 {dimension_numbers = #tpu.dot_dimension_numbers<[2], [1], [1], [2], [0, 0, 0, 1, 1, 2], [0], [0]>} : vector<1x8x8xf32>, vector<1x8x8xf32>, vector<1x8x8xf32> -> vector<1x8x8xf32>
    "tpu.trace_stop"() : () -> ()
    %81 = vector.shape_cast %80 : vector<1x8x8xf32> to vector<8x8xf32>
    %82 = tpu.concatenate %24, %43, %62, %81 in 1 : vector<8x8xf32>, vector<8x8xf32>, vector<8x8xf32>, vector<8x8xf32> -> vector<8x32xf32>
    %c0_21 = arith.constant 0 : index
    %c0_22 = arith.constant 0 : index
    %83 = vector.load %arg4[%c0_21, %c0_22] : memref<32x32xf32, #tpu.memory_space<vmem>>, vector<32x32xf32>
    %cst_23 = arith.constant dense<0.000000e+00> : vector<8x32xf32>
    %84 = tpu.matmul %82, %83, %cst_23 {dimension_numbers = #tpu.dot_dimension_numbers<[1], [0], [0], [1], [0, 0, 1, 1], [], []>} : vector<8x32xf32>, vector<32x32xf32>, vector<8x32xf32> -> vector<8x32xf32>
    %c0_24 = arith.constant 0 : index
    %c0_25 = arith.constant 0 : index
    %85 = vector.load %arg5[%c0_24, %c0_25] : memref<1x32xf32, #tpu.memory_space<vmem>>, vector<1x32xf32>
    %86 = vector.broadcast %85 : vector<1x32xf32> to vector<8x32xf32>
    %87 = arith.addf %84, %86 : vector<8x32xf32>
    %c0_26 = arith.constant 0 : index
    %c0_27 = arith.constant 0 : index
    %88 = vector.load %arg6[%c0_26, %c0_27] : memref<8x32xf32, #tpu.memory_space<vmem>>, vector<8x32xf32>
    tpu.vector_store %arg6[%c0_26, %c0_27], %87 {strides = array<i32>} : memref<8x32xf32, #tpu.memory_space<vmem>>, vector<8x32xf32>,
    return
  }
  func.func @transform_0(%arg0: i32) -> (i32, i32) {
    %c0_i32 = arith.constant 0 : i32
    %c0_i32_0 = arith.constant 0 : i32
    return %arg0, %c0_i32 : i32, i32
  }
  func.func @transform_1(%arg0: i32) -> (i32, i32) {
    %c0_i32 = arith.constant 0 : i32
    %c0_i32_0 = arith.constant 0 : i32
    %c0_i32_1 = arith.constant 0 : i32
    return %c0_i32, %c0_i32_0 : i32, i32
  }
  func.func @transform_2(%arg0: i32) -> (i32, i32) {
    %c0_i32 = arith.constant 0 : i32
    %c0_i32_0 = arith.constant 0 : i32
    %c0_i32_1 = arith.constant 0 : i32
    return %c0_i32, %c0_i32_0 : i32, i32
  }
  func.func @transform_3(%arg0: i32) -> (i32, i32) {
    %c0_i32 = arith.constant 0 : i32
    %c0_i32_0 = arith.constant 0 : i32
    %c0_i32_1 = arith.constant 0 : i32
    return %c0_i32, %c0_i32_0 : i32, i32
  }
  func.func @transform_4(%arg0: i32) -> (i32, i32) {
    %c0_i32 = arith.constant 0 : i32
    %c0_i32_0 = arith.constant 0 : i32
    %c0_i32_1 = arith.constant 0 : i32
    return %c0_i32, %c0_i32_0 : i32, i32
  }
  func.func @transform_5(%arg0: i32) -> (i32, i32) {
    %c0_i32 = arith.constant 0 : i32
    %c0_i32_0 = arith.constant 0 : i32
    return %arg0, %c0_i32 : i32, i32
  }
}

</mosaic_0001>

<bundles_post_ra>
// kernel: tpu_custom_call.1
= control target key start
LH: loop header
LB: loop body
LE: loop exit
PB: predicated region body
PF: predicated region fallthrough
CT: control target
= control target key end

     0   :  { %10 = vsyncpa [#allocation3], 0  ;;  %s1977_s0 = inlined_call_operand.hbm [shape: f32[16,32], index: 0, kind: input, shape index: {}]   ;;  %s1978_s1 = inlined_call_operand.hbm [shape: f32[32,96], index: 1, kind: input, shape index: {}]   ;;  %s1979_s2 = inlined_call_operand.vmem [shape: f32[1,96], index: 2, kind: input, shape index: {}]   ;;  %s1980_s3 = inlined_call_operand.hbm [shape: f32[32,32], index: 3, kind: input, shape index: {}]   ;;  %s1981_s4 = inlined_call_operand.vmem [shape: f32[1,32], index: 4, kind: input, shape index: {}]   ;;  %s1982_s5 = inlined_call_operand.hbm [shape: f32[16,32], index: 5, kind: output, shape index: {}]  }
   0x1   :  { %12 = vsyncpa [#allocation3 + $0x1], 0 }
   0x2   :  { %13 = vsyncpa [#allocation6], 0 }
   0x3   :  { %14 = vsyncpa [#allocation4], 0 }
   0x4   :  { %16 = vsyncpa [#allocation4 + $0x1], 0  ;;  %s1665_s18 = smov 0   ;;  %s1667_s19 = smov 0  }
   0x5   :  { %s1669_s20 = smov 0   ;;  %s1671_s21 = smov 0  }
   0x6 LB: > { %s1686_s22 = sadd.s32 4294967295, %s1610_s21   ;;  %s1220_s23 = sadd.s32 4294967294, %s1610_s21   ;;  %s1610_s21 = sphi %s1671_s21, %s2002_s21   ;;  %s1606_s20 = sphi %s1669_s20, %s2001_s20   ;;  %s1602_s19 = sphi %s1667_s19, %s2000_s19   ;;  %s1598_s18 = sphi %s1665_s18, %s1999_s18  }
   0x7   : > { %p42_p0 = scmp.ne.s32.totalorder %s1602_s19, %s1598_s18  ;;  %p1983_p1 = scmp.eq.s32.totalorder %s1686_s22, 0 }
   0x8   : > { %p156_p3 = scmp.eq.s32.totalorder %s1220_s23, 1  ;;  %p1221_p5 = scmp.ge.s32.totalorder %s1610_s21, 1 }
   0x9   : > { %p1695_p4 = por %p1983_p1, %p42_p0  ;;  %p163_p7 = scmp.lt.s32.totalorder %s1610_s21, 3 }
   0xa   : > { %p1700_p6 = por %p156_p3, %p42_p0  ;;  %s1612_s27 = smov [#allocation5]  }
   0xb   : > { %s1986_s24 = scalar_select %p1695_p4, 1, 0 }
   0xc   : > { %s1987_s25 = scalar_select %p1700_p6, 1, 0 }
   0xd   : > { %p1705_p8 = pnand %p1221_p5, %p163_p7  ;;  %s175_s28 = sshll.u32 %s1612_s27, 4  ;;  %s1709_s28 = int_to_ptr.vmem [resolvable:$true] %s175_s28 }
   0xe   : > { %s1613_s30 = smov [#allocation7]   ;;  %s1454_s9 = scalar_lea.hbm %s1978_s1, 512 }
   0xf   : > { %p1364_p9 = pneg %p1705_p8  ;;  %s191_s6 = sshll.u32 %s1613_s30, 4  ;;  %s1720_s6 = int_to_ptr.vmem [resolvable:$true] %s191_s6 }
  0x10   : > { %p1455_p12 = scmp.ne.s32.totalorder %s1978_s1, %s1454_s9  ;;  %p1461_p5 = scmp.lt.u32.totalorder %s1454_s9, %s1978_s1 }
  0x11   : > { %p1716_p11 = pnand %p1364_p9, %p1983_p1 }
  0x13   : > { %p1456_p13 = pneg %p1716_p11 }
  0x15   : > { %p1457_p0 = pnand %p1456_p13, %p1455_p12 }
  0x17   : > { %p1458_p3 = pneg %p1457_p0 }
  0x19   : > { %p1463_p7 = pnand %p1461_p5, %p1458_p3 }
  0x1b   : > { %1466 = shalt.err (!%p1463_p7)
}
  0x1c   : > { %s1467_s14 = scalar_lea.vmem %s1709_s28, 512  ;;  %p1475_p2 = scmp.lt.s32.totalorder %s1709_s28, %s1709_s28 }
  0x1d   : > { %p1468_p9 = scmp.ne.s32.totalorder %s1709_s28, %s1467_s14  ;;  %p1476_p12 = scmp.lt.s32.totalorder %s1467_s14, %s1467_s14 }
  0x1f   : > { %p1470_p10 = pnand %p1468_p9, %p1456_p13  ;;  %p1477_p0 = por %p1476_p12, %p1475_p2 }
  0x21   : > { %p1471_p1 = pneg %p1470_p10 }
  0x23   : > { %p1478_p6 = pnand %p1477_p0, %p1471_p1 }
  0x25   : > { %1481 = shalt.err (!%p1478_p6)
}
  0x26   : > { %s1614_s15 = smov 128   ;;  %s1615_s16 = smov 8  }
  0x27   : > { %1367 = dma.hbm_to_vmem [thread:$0]  (!%p1716_p11), %s1978_s1, 512, %s1709_s28, [#allocation6], %s1614_s15, %s1614_s15, %s1615_s16  }
  0x28   : > { %s1482_s7 = scalar_lea.hbm %s1980_s3, 512 }
  0x29   : > { %p1483_p2 = scmp.ne.s32.totalorder %s1980_s3, %s1482_s7  ;;  %p1489_p10 = scmp.lt.u32.totalorder %s1482_s7, %s1980_s3 }
  0x2b   : > { %p1485_p1 = pnand %p1483_p2, %p1456_p13 }
  0x2d   : > { %p1486_p6 = pneg %p1485_p1 }
  0x2f   : > { %p1491_p3 = pnand %p1489_p10, %p1486_p6 }
  0x31   : > { %1494 = shalt.err (!%p1491_p3)
}
  0x32   : > { %s1495_s28 = scalar_lea.vmem %s1720_s6, 512  ;;  %p1503_p12 = scmp.lt.s32.totalorder %s1720_s6, %s1720_s6 }
  0x33   : > { %p1496_p5 = scmp.ne.s32.totalorder %s1720_s6, %s1495_s28  ;;  %p1504_p0 = scmp.lt.s32.totalorder %s1495_s28, %s1495_s28 }
  0x35   : > { %p1498_p7 = pnand %p1496_p5, %p1456_p13  ;;  %p1505_p2 = por %p1504_p0, %p1503_p12 }
  0x37   : > { %p1499_p9 = pneg %p1498_p7 }
  0x39   : > { %p1506_p1 = pnand %p1505_p2, %p1499_p9 }
  0x3b   : > { %1509 = shalt.err (!%p1506_p1)
}
  0x3c   : > { %1370 = dma.hbm_to_vmem [thread:$0]  (!%p1716_p11), %s1980_s3, 512, %s1720_s6, [#allocation6], %s1614_s15, %s1614_s15, %s1615_s16  }
  0x3d   : > { %s1775_s14 = sadd.s32 1, %s1610_s21   ;;  %s29_s29 = sadd.s32 1, %s1606_s20 }
  0x3e   : > { %s26_s17 = ssub.s32 %s1610_s21, %s1775_s14  ;;  %p36_p13 = scmp.ne.s32.totalorder %s1606_s20, %s1602_s19 }
  0x3f   : > { %p27_p6 = scmp.eq.s32.totalorder %s26_s17, 0  ;;  %p37_p10 = scmp.eq.s32.totalorder %s1610_s21, 0 }
  0x40   : > { %p1990_p3 = scmp.eq.s32.totalorder %s1686_s22, 1  ;;  %p1381_p7 = scmp.lt.s32.totalorder %s1610_s21, 2 }
  0x41   : > { %s1791_s27 = scalar_select %p27_p6, %s1606_s20, %s29_s29  }
  0x42   : > { %p1785_p5 = por %p1990_p3, %p36_p13  ;;  %p38_p9 = por %p37_p10, %p36_p13 }
  0x43   : > { %s208_s30 = sand.u32 1, %s1606_s20   ;;  %s1226_s6 = sshll.u32 %s1610_s21, 7 }
  0x44   : > { %s1991_s23 = scalar_select %p1785_p5, 1, 0 }
  0x45   : > { %s1225_s7 = sshll.u32 %s208_s30, 3  ;;  %s1798_s8 = scalar_lea.hbm %s1977_s0, %s1226_s6 }
  0x46   : > { %s212_s9 = scalar_lea.vmem [#allocation2], %s1225_s7  ;;  %p1802_p11 = pnand %p1381_p7, %p38_p9 }
  0x47   : > { %s219_s10 = sshll.u32 %s212_s9, 4  ;;  %s209_s28 = scalar_lea.sflag [#allocation3], %s208_s30  ;;  %s1800_s10 = int_to_ptr.vmem [resolvable:$true] %s219_s10 }
  0x48   : > { %s1510_s12 = scalar_lea.hbm %s1798_s8, 128  ;;  %p1512_p0 = pneg %p1802_p11 }
  0x49   : > { %p1511_p12 = scmp.ne.s32.totalorder %s1798_s8, %s1510_s12  ;;  %s1515_s17 = scalar_lea.hbm %s1977_s0, 256 }
  0x4a   : > { %p1516_p13 = scmp.lt.u32.totalorder %s1798_s8, %s1977_s0  ;;  %p1517_p6 = scmp.lt.u32.totalorder %s1515_s17, %s1510_s12 }
  0x4b   : > { %p1513_p2 = pnand %p1512_p0, %p1511_p12  ;;  %p1519_p3 = scmp.lt.u32.totalorder %s1510_s12, %s1798_s8 }
  0x4c   : > { %p1518_p10 = por %p1517_p6, %p1516_p13 }
  0x4d   : > { %p1514_p1 = pneg %p1513_p2 }
  0x4e   : > { %p1520_p7 = por %p1519_p3, %p1518_p10 }
  0x50   : > { %p1521_p9 = pnand %p1520_p7, %p1514_p1 }
  0x52   : > { %1524 = shalt.err (!%p1521_p9)
}
  0x53   : > { %s1525_s30 = scalar_lea.vmem %s1800_s10, 128  ;;  %s1616_s15 = smov [#allocation2]  }
  0x54   : > { %p1526_p12 = scmp.ne.s32.totalorder %s1800_s10, %s1525_s30  ;;  %s1530_s16 = sshll.u32 %s1616_s15, 4  ;;  %s1531_s16 = int_to_ptr.vmem [resolvable:$false] %s1530_s16 }
  0x55   : > { %s1532_s9 = scalar_lea.vmem %s1531_s16, 256  ;;  %p1533_p4 = scmp.lt.s32.totalorder %s1800_s10, %s1531_s16 }
  0x56   : > { %p1528_p2 = pnand %p1526_p12, %p1512_p0  ;;  %p1534_p13 = scmp.lt.s32.totalorder %s1532_s9, %s1525_s30 }
  0x58   : > { %p1529_p5 = pneg %p1528_p2  ;;  %p1535_p6 = por %p1534_p13, %p1533_p4 }
  0x5a   : > { %p1536_p10 = pnand %p1535_p6, %p1529_p5 }
  0x5c   : > { %1539 = shalt.err (!%p1536_p10)
}
  0x5d   : > { %1374 = dma.hbm_to_vmem [thread:$0]  (!%p1802_p11), %s1798_s8, 128, %s1800_s10, %s209_s28  }
  0x5e   : > { %228 = sbr.rel (%p1705_p8) target bundleno = 2107 (0x83b), region = 40  ;;  %s1834_s12 = sand.u32 (!%p1705_p8), 1, %s1602_s19  }
  0x5f   : > { %s1228_s13 = sshll.u32 (!%p1705_p8), %s1834_s12, 3  ;;  %s231_s29 = scalar_lea.sflag (!%p1705_p8), [#allocation3], %s1834_s12 }
  0x60   : > { %s234_s17 = scalar_lea.vmem (!%p1705_p8), [#allocation2], %s1228_s13  ;;  %p1993_p4 = scmp.ne.s32.totalorder (!%p1705_p8), %s1986_s24, 0 }
  0x65   : > { %1585 = dma.done.wait (%p1993_p4), %s231_s29, 128  }
  0x66   : > { %1587 = vsyncadd (%p1993_p4), %s231_s29, 4294967168  ;;  %p1994_p5 = scmp.eq.s32.totalorder %s1686_s22, 0 }
  0x68   : > { %1589 = dma.done.wait (%p1994_p5), [#allocation6], 1024   ;;  %p1995_p8 = pmov %p1994_p5 }
  0x69   : > { %v1617_v0 = vmov 0.0|0.0   ;;  %vm1618_vm0 = vmmov 0   ;;  %v1619_v1 = vmov 0.0   ;;  %v270_v2 = vld [vmem:[#allocation5] sm:$0xff]  ;;  %v271_v3 = vld [vmem:[#allocation5 + $0x8] sm:$0xff]  ;;  %v272_v4 = vld [vmem:[#allocation5 + $0x10] sm:$0xff] }
  0x6a   : > { %1591 = vsyncadd (%p1995_p8), [#allocation6], 4294966272  ;;  %1340 = vmatprep.subr.bf16.mxu0 %v1617_v0  ;;  %1286 = vmatprep.mubr.msk.f32.mxu0 %vm1618_vm0, %v1619_v1  ;;  %v1341_v5 = vpack.c.bf16 %v271_v3, %v270_v2  ;;  %v273_v6 = vld [vmem:[#allocation5 + $0x18] sm:$0xff]  ;;  %vm281_vm1 = vcmask 261120   ;;  %v1232_v9 = vld [vmem:[%s1979_s2] ss:$0 sm:$0xff] }
  0x6b   : > { %1289 = vmatprep.subr.mxu1 %v1619_v1  ;;  %1291 = vmatprep.mubr.msk.f32.mxu1 %vm1618_vm0, %v1619_v1  ;;  %v1344_v7 = vpack.c.bf16 %v273_v6, %v272_v4  ;;  %v269_v8 = vld [vmem:[%s234_s17] sm:$0xff]  ;;  %s1620_s8 = smov 64   ;;  %s1621_s10 = smov 96   ;;  %vm358_vm2 = vcmask 64512   ;;  %vm1028_vm3 = vcmask 130048   ;;  %vm1030_vm4 = vcmask 195584  }
  0x6c   : > { %1342 = vmatpush3.bf16.msra.mxu0 %v1341_v5  ;;  %s1622_s11 = smov 88   ;;  %s1623_s28 = smov 120  }
  0x6d   : > { %1343 = vmatprep.subr.bf16.mxu0 %v1617_v0  ;;  %s1624_s7 = smov 80   ;;  %s1625_s6 = smov 72  }
  0x6e   : > { %s1626_s30 = smov 112   ;;  %s1627_s15 = smov 104  }
  0x6f   : > { %s1628_s16 = smov 56   ;;  %s1629_s9 = smov 48  }
  0x70   : > { %1345 = vmatpush3.bf16.msra.mxu0 %v1344_v7  ;;  %s1630_s29 = smov 40   ;;  %s1631_s17 = smov 8  }
  0x71   : > { %1309 = vmatprep.subr.mxu0 %v1619_v1  ;;  %s1632_s24 = smov 16   ;;  %s1633_s26 = smov 24  }
  0x72   : > { %p1996_p0 = scmp.ne.s32.totalorder %s1991_s23, 0 }
  0x73   : > { %1287 = vmatmul.mubr.msk.f32.vlgmr.msra.gmra.mrb[0].mxu0 %vm281_vm1, %v269_v8  ;;  %v1032_v8 = vld [vmem:[#allocation7] sm:$0xff] }
  0x74   : > { %1311 = vmatprep.mubr.msk.f32.mxu0 %vm1618_vm0, %v1619_v1 }
 0x146   : > { %v351_v10 = vpop.f32.mrb[0].mxu0 }
 0x147   : > { %v1862_v11 = vadd.f32 %v1232_v9, %v351_v10  ;;  %v1288_v12 = vpop.f32.mrb[1].mxu0  ;;  %v1033_v9 = vld [vmem:[#allocation7 + $0x8] sm:$0xff] }
 0x148   : > { %v1347_v10 = vpack.c.bf16 %v1033_v9, %v1032_v8  ;;  %v1035_v12 = vld [vmem:[#allocation7 + $0x18] sm:$0xff] }
 0x149   : > { %444 = vrot.lane.b32.xlu1 %v1862_v11, %s1620_s8  ;;  %356 = vrot.lane.b32.xlu0 %v1862_v11, %s1621_s10 }
 0x14d   : > { %522 = vrot.lane.b32.xlu1 %v1862_v11, %s1622_s11  ;;  %s1249_s11 = sshll.u32 %s1686_s22, 7 }
 0x151   : > { %520 = vrot.lane.b32.xlu1 %v1862_v11, %s1623_s28  ;;  %s268_s28 = scalar_lea.vmem [#allocation8], %s1228_s13  ;;  %s1634_s13 = smov [#allocation8]  }
 0x155   : > { %687 = vrot.lane.b32.xlu1 %v1862_v11, %s1624_s7  ;;  %s1131_s7 = sshll.u32 %s268_s28, 4  ;;  %s1934_s7 = int_to_ptr.vmem [resolvable:$true] %s1131_s7 }
 0x156   : > { %s1540_s22 = scalar_lea.vmem %s1934_s7, 128 }
 0x157   : > { %p1541_p11 = scmp.ne.s32.totalorder %s1934_s7, %s1540_s22 }
 0x159   : > { %p1542_p1 = pnand %p1541_p11, %p1996_p0 }
 0x15b   : > { %p1543_p3 = pneg %p1542_p1 }
 0x1bb   : > { %v445_v13 = vpop.permute.xlu1 %444  ;;  %v357_v14 = vpop.permute.xlu0 %356 }
 0x1bc   : > { %1290 = vmatpush3.xpose.msk.msra.mxu1 %vm358_vm2, %v357_v14 }
 0x1bd   : > { %1294 = vmatprep.subr.mxu1 %v1619_v1 }
 0x1bf   : > { %v523_v15 = vpop.permute.xlu1 %522  ;;  %1292 = vmatmul.mubr.msk.f32.vlgmr.msra.gmra.mrb[0].mxu1 %vm358_vm2, %v1862_v11 }
 0x1c0   : > { %1295 = vmatpush3.msra.mxu1 %v445_v13  ;;  %1296 = vmatprep.mubr.msk.f32.mxu1 %vm1618_vm0, %v1619_v1 }
 0x1c1   : > { %1299 = vmatprep.subr.mxu1 %v1619_v1 }
 0x1c3   : > { %v521_v16 = vpop.permute.xlu1 %520 }
 0x1c7   : > { %v688_v17 = vpop.permute.xlu1 %687 }
 0x1c8   : > { %1310 = vmatpush3.xpose.msk.msra.mxu0 %vm358_vm2, %v688_v17 }
 0x1c9   : > { %1319 = vmatprep.subr.mxu0 %v1619_v1 }
 0x292   : > { %v429_v18 = vpop.f32.mrb[0].mxu1 }
 0x293   : > { %v1293_v19 = vpop.f32.mrb[1].mxu1  ;;  %v433_v20 = vsel %vm358_vm2, %v429_v18, -inf }
 0x294   : > { %434 = vmax.xlane.f32.xlu0 %v433_v20 }
 0x2aa   : > { %852 = vrot.lane.b32.xlu0 %v1862_v11, %s1625_s6 }
 0x321   : > { %v435_v21 = vpop.xlane.xlu0 %434 }
 0x322   : > { %v436_v22 = vsub.f32 %v429_v18, %v435_v21 }
 0x324   : > { %v437_v23 = vmul.f32 1.442695, %v436_v22 }
 0x325   : > { %v853_v28 = vpop.permute.xlu0 %852 }
 0x326   : > { %1438 = vpow2.f32 %v437_v23 }
 0x330   : > { %v1439_v24 = vpop.eup %1438 }
 0x331   : > { %v439_v25 = vsel %vm358_vm2, %v1439_v24, 0.0 }
 0x332   : > { %440 = vadd.xlane.f32.xlu1 %v439_v25 }
 0x343   : > { %685 = vrot.lane.b32.xlu1 %v1862_v11, %s1626_s30 }
 0x347   : > { %850 = vrot.lane.b32.xlu1 %v1862_v11, %s1627_s15  ;;  %s1932_s15 = scalar_lea.hbm %s1982_s5, %s1249_s11 }
 0x3bf   : > { %v441_v26 = vpop.xlane.xlu1 %440 }
 0x3c0   : > { %1440 = vrcp.f32 %v441_v26 }
 0x3c3   : > { %v686_v27 = vpop.permute.xlu1 %685 }
 0x3c4   : > { %1312 = vmatmul.mubr.msk.f32.vlgmr.msra.gmra.mrb[2].mxu0 %vm358_vm2, %v686_v27 }
 0x3c5   : > { %1320 = vmatpush3.xpose.msk.msra.mxu0 %vm358_vm2, %v853_v28  ;;  %1321 = vmatprep.mubr.msk.f32.mxu0 %vm1618_vm0, %v1619_v1 }
 0x3c6   : > { %1346 = vmatprep.subr.bf16.mxu0 %v1617_v0 }
 0x3c7   : > { %v851_v29 = vpop.permute.xlu1 %850 }
 0x3c8   : > { %1322 = vmatmul.mubr.msk.f32.vlgmr.msra.gmra.mrb[4].mxu0 %vm358_vm2, %v851_v29 }
 0x3c9   : > { %1337 = vmatprep.mubr.msk.f32.mxu0 %vm1618_vm0, %v1619_v1  ;;  %1348 = vmatpush3.bf16.msra.mxu0 %v1347_v10 }
 0x3ca   : > { %v1441_v30 = vpop.eup %1440  ;;  %1349 = vmatprep.subr.bf16.mxu0 %v1617_v0 }
 0x3cb   : > { %v443_v31 = vmul.f32 %v1441_v30, %v1439_v24  ;;  %v1246_v24 = vld [vmem:[%s1981_s4] ss:$0 sm:$0xff] }
 0x3cd   : > { %1297 = vmatmul.mubr.msk.f32.vlgmr.msra.gmra.mrb[2].mxu1 %vm358_vm2, %v443_v31 }
 0x3ce   : > { %1300 = vmatpush3.xpose.msk.msra.mxu1 %vm358_vm2, %v523_v15  ;;  %1301 = vmatprep.mubr.msk.f32.mxu1 %vm1618_vm0, %v1619_v1 }
 0x3cf   : > { %1304 = vmatprep.subr.mxu1 %v1619_v1 }
 0x3d1   : > { %1302 = vmatmul.mubr.msk.f32.vlgmr.msra.gmra.mrb[4].mxu1 %vm358_vm2, %v521_v16 }
 0x3d2   : > { %1306 = vmatprep.mubr.msk.f32.mxu1 %vm1618_vm0, %v1619_v1 }
 0x497   : > { %v759_v32 = vpop.f32.mrb[2].mxu0 }
 0x498   : > { %v1313_v33 = vpop.f32.mrb[3].mxu0  ;;  %v763_v34 = vsel %vm358_vm2, %v759_v32, -inf }
 0x499   : > { %764 = vmax.xlane.f32.xlu0 %v763_v34 }
 0x49b   : > { %v924_v35 = vpop.f32.mrb[4].mxu0 }
 0x49c   : > { %v1323_v36 = vpop.f32.mrb[5].mxu0  ;;  %v928_v42 = vsel %vm358_vm2, %v924_v35, -inf }
 0x4a0   : > { %v1900_v37 = vpop.f32.mrb[2].mxu1 }
 0x4a1   : > { %v1298_v38 = vpop.f32.mrb[3].mxu1 }
 0x4a4   : > { %v594_v39 = vpop.f32.mrb[4].mxu1 }
 0x4a5   : > { %v1303_v40 = vpop.f32.mrb[5].mxu1  ;;  %v598_v41 = vsel %vm358_vm2, %v594_v39, -inf }
 0x4a6   : > { %599 = vmax.xlane.f32.xlu1 %v598_v41 }
 0x4aa   : > { %929 = vmax.xlane.f32.xlu1 %v928_v42 }
 0x526   : > { %v765_v43 = vpop.xlane.xlu0 %764 }
 0x527   : > { %v766_v44 = vsub.f32 %v759_v32, %v765_v43 }
 0x529   : > { %v767_v45 = vmul.f32 1.442695, %v766_v44 }
 0x52b   : > { %1442 = vpow2.f32 %v767_v45 }
 0x533   : > { %v600_v46 = vpop.xlane.xlu1 %599 }
 0x534   : > { %v601_v54 = vsub.f32 %v594_v39, %v600_v46 }
 0x535   : > { %v1443_v47 = vpop.eup %1442 }
 0x536   : > { %v769_v48 = vsel %vm358_vm2, %v1443_v47, 0.0  ;;  %v602_v55 = vmul.f32 1.442695, %v601_v54 }
 0x537   : > { %770 = vadd.xlane.f32.xlu1 %v769_v48  ;;  %v930_v49 = vpop.xlane.xlu1 %929 }
 0x538   : > { %v931_v50 = vsub.f32 %v924_v35, %v930_v49 }
 0x53a   : > { %v932_v51 = vmul.f32 1.442695, %v931_v50 }
 0x53c   : > { %1444 = vpow2.f32 %v932_v51 }
 0x53d   : > { %1446 = vpow2.f32 %v602_v55 }
 0x546   : > { %v1445_v52 = vpop.eup %1444 }
 0x547   : > { %v934_v53 = vsel %vm358_vm2, %v1445_v52, 0.0  ;;  %v1447_v56 = vpop.eup %1446 }
 0x548   : > { %609 = vrot.lane.b32.xlu1 %v1862_v11, %s1628_s16  ;;  %935 = vadd.xlane.f32.xlu0 %v934_v53  ;;  %v604_v57 = vsel %vm358_vm2, %v1447_v56, 0.0  ;;  %s1118_s16 = scalar_lea.sflag [#allocation4], %s1834_s12 }
 0x55e   : > { %774 = vrot.lane.b32.xlu0 %v1862_v11, %s1629_s9  ;;  %s1544_s9 = sshll.u32 %s1634_s13, 4  ;;  %s1545_s9 = int_to_ptr.vmem [resolvable:$false] %s1544_s9 }
 0x55f   : > { %p1547_p7 = scmp.lt.s32.totalorder %s1934_s7, %s1545_s9 }
 0x56c   : > { %605 = vadd.xlane.f32.xlu1 %v604_v57 }
 0x57d   : > { %939 = vrot.lane.b32.xlu1 %v1862_v11, %s1630_s29  ;;  %v1034_v11 = vld [vmem:[#allocation7 + $0x10] sm:$0xff]  ;;  %s1546_s29 = scalar_lea.vmem %s1545_s9, 256 }
 0x57e   : > { %v1350_v13 = vpack.c.bf16 %v1035_v12, %v1034_v11  ;;  %p1548_p9 = scmp.lt.s32.totalorder %s1546_s29, %s1540_s22 }
 0x580   : > { %1351 = vmatpush3.bf16.msra.mxu0 %v1350_v13  ;;  %p1549_p12 = por %p1548_p9, %p1547_p7 }
 0x582   : > { %p1550_p2 = pnand %p1549_p12, %p1543_p3 }
 0x5c4   : > { %v771_v58 = vpop.xlane.xlu1 %770 }
 0x5c8   : > { %v610_v59 = vpop.permute.xlu1 %609 }
 0x5c9   : > { %1305 = vmatpush3.msra.mxu1 %v610_v59 }
 0x5ca   : > { %1314 = vmatprep.subr.mxu1 %v1619_v1 }
 0x5d5   : > { %v936_v61 = vpop.xlane.xlu0 %935 }
 0x5d9   : > { %v775_v3 = vpop.permute.xlu0 %774 }
 0x5f9   : > { %v606_v60 = vpop.xlane.xlu1 %605 }
 0x5fa   : > { %1448 = vrcp.f32 %v606_v60 }
 0x5fb   : > { %1450 = vrcp.f32 %v771_v58 }
 0x5fc   : > { %1452 = vrcp.f32 %v936_v61 }
 0x5fd   : > { %v940_v6 = vpop.permute.xlu1 %939 }
 0x604   : > { %v1449_v62 = vpop.eup %1448 }
 0x605   : > { %v608_v63 = vmul.f32 %v1449_v62, %v1447_v56  ;;  %v1451_v2 = vpop.eup %1450 }
 0x606   : > { %v773_v4 = vmul.f32 %v1451_v2, %v1443_v47  ;;  %v1453_v5 = vpop.eup %1452 }
 0x607   : > { %1307 = vmatmul.mubr.msk.f32.vlgmr.msra.gmra.mrb[6].mxu1 %vm358_vm2, %v608_v63  ;;  %v938_v7 = vmul.f32 %v1453_v5, %v1445_v52 }
 0x608   : > { %1315 = vmatpush3.msra.mxu1 %v775_v3  ;;  %1316 = vmatprep.mubr.msk.f32.mxu1 %vm1618_vm0, %v1619_v1 }
 0x609   : > { %1324 = vmatprep.subr.mxu1 %v1619_v1 }
 0x60b   : > { %1317 = vmatmul.mubr.msk.f32.vlgmr.msra.gmra.mrb[8].mxu1 %vm358_vm2, %v773_v4 }
 0x60c   : > { %1325 = vmatpush3.msra.mxu1 %v940_v6  ;;  %1326 = vmatprep.mubr.msk.f32.mxu1 %vm1618_vm0, %v1619_v1 }
 0x60f   : > { %1327 = vmatmul.mubr.msk.f32.vlgmr.msra.gmra.mrb[10].mxu1 %vm358_vm2, %v938_v7 }
 0x6da   : > { %v681_v14 = vpop.f32.mrb[6].mxu1 }
 0x6db   : > { %1016 = vrot.lane.b32.xlu1 %v681_v14, %s1631_s17  ;;  %v1308_v15 = vpop.f32.mrb[7].mxu1 }
 0x6de   : > { %v846_v16 = vpop.f32.mrb[8].mxu1 }
 0x6df   : > { %1020 = vrot.lane.b32.xlu0 %v846_v16, %s1632_s24  ;;  %v1318_v1 = vpop.f32.mrb[9].mxu1 }
 0x6e2   : > { %v1011_v17 = vpop.f32.mrb[10].mxu1 }
 0x6e3   : > { %1024 = vrot.lane.b32.xlu1 %v1011_v17, %s1633_s26  ;;  %v1328_v18 = vpop.f32.mrb[11].mxu1 }
 0x74d   : > { %v1017_v19 = vpop.permute.xlu1 %1016 }
 0x74e   : > { %v1027_v20 = vsel %vm358_vm2, %v1900_v37, %v1017_v19 }
 0x751   : > { %v1021_v0 = vpop.permute.xlu0 %1020 }
 0x752   : > { %v1029_v21 = vsel %vm1028_vm3, %v1027_v20, %v1021_v0 }
 0x755   : > { %v1025_v22 = vpop.permute.xlu1 %1024 }
 0x756   : > { %v1031_v23 = vsel %vm1030_vm4, %v1029_v21, %v1025_v22 }
 0x757   : > { %1338 = vmatmul.mubr.msk.f32.vlgmr.msra.gmra.mrb[6].mxu0 %vm281_vm1, %v1031_v23 }
 0x82a   : > { %v1112_v25 = vpop.f32.mrb[6].mxu0 }
 0x82b   : > { %v1113_v26 = vadd.f32 %v1246_v24, %v1112_v25  ;;  %v1339_v27 = vpop.f32.mrb[7].mxu0 }
 0x82d   : > { %1116 = vst.msk [vmem:[%s268_s28] sm:$0xff] %vm281_vm1, %v1113_v26 }
 0x82e   : > { %1553 = shalt.err (!%p1550_p2)
}
 0x82f   : > { %s1554_s12 = scalar_lea.hbm %s1932_s15, 128  ;;  %s1558_s26 = scalar_lea.hbm %s1982_s5, 256 }
 0x830   : > { %p1555_p13 = scmp.ne.s32.totalorder %s1932_s15, %s1554_s12  ;;  %p1559_p4 = scmp.lt.u32.totalorder %s1932_s15, %s1982_s5 }
 0x831   : > { %p1560_p5 = scmp.lt.u32.totalorder %s1558_s26, %s1554_s12  ;;  %p1562_p11 = scmp.lt.u32.totalorder %s1554_s12, %s1932_s15 }
 0x832   : > { %p1556_p6 = pnand %p1555_p13, %p1996_p0 }
 0x833   : > { %p1561_p8 = por %p1560_p5, %p1559_p4 }
 0x834   : > { %p1557_p10 = pneg %p1556_p6 }
 0x835   : > { %p1563_p1 = por %p1562_p11, %p1561_p8 }
 0x837   : > { %p1564_p3 = pnand %p1563_p1, %p1557_p10 }
 0x839   : > { %1567 = shalt.err (!%p1564_p3)
}
 0x83a   : > { %1362 = dma.vmem_to_hbm [thread:$0]  (%p1996_p0), %s1934_s7, 128, %s1932_s15, %s1118_s16  }
 0x83b PF: > { %s1143_s11 = sand.u32 1, %s1598_s18   ;;  %p1997_p7 = scmp.ne.s32.totalorder %s1987_s25, 0 }
 0x83c   : > { %p1998_p9 = scmp.ge.s32.totalorder %s1610_s21, 2  ;;  %s1144_s28 = scalar_lea.sflag [#allocation4], %s1143_s11 }
 0x83e   : > { %p1376_p12 = pnand %p1998_p9, %p1997_p7 }
 0x840   : > { %1593 = dma.done.wait (!%p1376_p12), %s1144_s28, 128  }
 0x841   : > { %1595 = vsyncadd (!%p1376_p12), %s1144_s28, 4294967168  ;;  %p19_p2 = scmp.ge.s32.totalorder %s1775_s14, 4   ;;  %s1999_s18 = smov %s1602_s19 }
 0x842   : > { %s2000_s19 = smov %s1606_s20  ;;  %s2001_s20 = smov %s1791_s27 }
 0x843   : > { %s2002_s21 = smov %s1775_s14  ;;  %21 = sbr.rel (!%p19_p2) target bundleno = 6 (0x6), region = 93 }
 0x84a   :  { %1149 = vsyncpa [#allocation3], 1 }
 0x84b   :  { %1151 = vsyncpa [#allocation3 + $0x1], 1 }
 0x84c   :  { %1152 = vsyncpa [#allocation6], 1 }
 0x84d   :  { %1153 = vsyncpa [#allocation4], 1 }
 0x84e   :  { %1155 = vsyncpa [#allocation4 + $0x1], 1 }

</bundles_post_ra>
